<compile_context>
chip_gen: v5e
topology: v5e:2x2
jax: 0.10.0
libtpu: 0.0.40
codegen_flags: <defaults>
</compile_context>

<pallas_src>
import functools

import jax
import jax.numpy as jnp
from jax import lax
from jax.experimental import pallas as pl
from jax.experimental.pallas import tpu as pltpu


def _attention_head_kernel(x_ref, wqkv_ref, bqkv_ref, o_ref, *, d_head, use_mask):
    bb, s, d_model = x_ref.shape

    # ---- fused QKV projection: bf16 operands -> f32 accumulator ---------------
    # Flatten (bb, S, d_model) -> (bb*S, d_model): leading-dim merge only (lane
    # dim unchanged) so it is cheap, and it fills the MXU M dimension.
    x2 = x_ref[...].reshape(bb * s, d_model).astype(jnp.bfloat16)
    qkv = jnp.dot(x2, wqkv_ref[...],                       # wqkv is bf16
                  preferred_element_type=jnp.float32)      # (bb*S, 3*dh) f32
    qkv = qkv + bqkv_ref[...].astype(jnp.float32)          # bias broadcast (f32)
    qkv = qkv.reshape(bb, s, 3 * d_head)                   # split leading dim

    # NOTE: the 1/sqrt(d_head) scale is already folded into the Q weights/bias
    # wrapper-side when use_mask=True.
    q = qkv[:, :, :d_head]                                 # (bb, S, dh) f32
    k = qkv[:, :, d_head:2 * d_head]
    v = qkv[:, :, 2 * d_head:]

    # ---- attention scores: einsum 'bqd,bkd->bqk' (no explicit transpose) ------
    scores = lax.dot_general(
        q, k,
        dimension_numbers=(((2,), (2,)), ((0,), (0,))),
        preferred_element_type=jnp.float32)                # (bb, S, S) f32

    if use_mask:
        # Single 2-D (S,S) comparison, broadcast over the batch.
        row = lax.broadcasted_iota(jnp.int32, (s, s), 0)
        col = lax.broadcasted_iota(jnp.int32, (s, s), 1)
        # Strict causal mask -> no row is ever fully masked, so exp() below is
        # NaN-safe.
        logits = jnp.where((col > row)[None, :, :], jnp.float32(-jnp.inf), scores)
    else:
        # Reference quirk: softmax of the UNSCALED, UNMASKED scores.
        logits = scores

    # ---- softmax (f32) ---------------------------------------------------------
    m = jnp.max(logits, axis=-1, keepdims=True)
    e = jnp.exp(logits - m)
    denom = jnp.sum(e, axis=-1, keepdims=True)
    pattern = e * pl.reciprocal(denom, approx=True)        # EUP vrcp (~free slot)

    # ---- weighted values: einsum 'bqk,bkd->bqd' (bf16 operands, f32 acc) ------
    attn_out = lax.dot_general(
        pattern.astype(jnp.bfloat16), v.astype(jnp.bfloat16),
        dimension_numbers=(((2,), (1,)), ((0,), (0,))),
        preferred_element_type=jnp.float32)                # (bb, S, dh) f32

    # Lane-dense store: merge (S, d_head) -> S*d_head lanes so the writeback is
    # full-width unmasked vst instead of 16-lane masked partial stores.
    o_ref[...] = attn_out.reshape(bb, s * d_head).astype(o_ref.dtype)


def attention_head(embeddings, wq, bq, wk, bk, wv, bv, *, mask=True,
                   batch_block=None, vmem_budget_bytes=20 * 1024 * 1024):
    """embeddings: (B, S, d_model) -> attn_out: (B, S, d_head)."""
    B, S, d_model = embeddings.shape
    d_head = wq.shape[1]

    # Fold the 1/sqrt(d_head) score scaling into the Q projection.  Only valid
    # on the masked path: the mask=False reference softmaxes UNSCALED scores.
    if mask:
        inv = jnp.asarray(1.0 / (d_head ** 0.5), dtype=wq.dtype)
        wq = wq * inv
        bq = bq * inv

    # Fuse Q/K/V weights and biases wrapper-side (one MXU pass in-kernel).
    # Weights are cast to bf16 here (MXU-native on all generations); bias stays
    # f32 since it is added to the f32 accumulator.
    wqkv = jnp.concatenate([wq, wk, wv], axis=1).astype(jnp.bfloat16)   # (dm, 3dh)
    bqkv = jnp.concatenate([bq, bk, bv]).astype(jnp.float32).reshape(1, 3 * d_head)

    # ---- per-generation heuristics (guarded; safe defaults if query fails) ----
    dev_kind = ""
    try:
        dev_kind = jax.devices()[0].device_kind.lower()
    except Exception:
        pass
    num_tc = 2 if "v7" in dev_kind else 1            # v7x: 2 TensorCores/chip
    target_rows = 128 if "v5" in dev_kind else 256   # MXU M height to fill

    itemsize = jnp.dtype(embeddings.dtype).itemsize

    def vmem_estimate(bb):
        tiles = 2 * bb * S * d_model * itemsize          # double-buffered x tile
        tiles += 2 * bb * S * d_head * itemsize          # double-buffered out tile
        tiles += 2 * d_model * 3 * d_head * 2            # bf16 wqkv (double-buffered)
        interm = 4 * (2 * bb * S * 3 * d_head            # qkv + q/k/v slices (f32)
                      + 3 * bb * S * S                   # scores / exp / pattern (f32)
                      + bb * S * d_head)                 # attn_out (f32)
        interm += 2 * bb * S * (d_model + S + d_head)    # bf16 copies (x2/pattern/v)
        return int(1.5 * (tiles + interm))               # headroom

    # ---- batch_block selection --------------------------------------------------
    if batch_block is None:
        bb_target = min(B, max(1, -(-target_rows // S)))  # ceil(target_rows / S)
        if num_tc > 1 and B >= 2 * num_tc:
            bb_target = min(bb_target, B // num_tc)       # keep both v7x TCs busy
    else:
        bb_target = max(1, min(int(batch_block), B))

    # bb must divide B, and (bb == B or bb % 8 == 0) keeps the flattened output
    # block sublane-aligned (second-minor dim multiple of 8 or full extent).
    candidates = [c for c in range(B, 0, -1)
                  if B % c == 0 and (c == B or c % 8 == 0)]
    feasible = [c for c in candidates
                if c <= bb_target and vmem_estimate(c) <= vmem_budget_bytes]
    if feasible:
        bb = feasible[0]
    else:
        fitting = [c for c in candidates if vmem_estimate(c) <= vmem_budget_bytes]
        bb = fitting[-1] if fitting else candidates[-1]

    kernel = functools.partial(_attention_head_kernel,
                               d_head=d_head, use_mask=mask)

    out_flat = pl.pallas_call(
        kernel,
        # Lane-dense output slab: (B, S*d_head); un-flattened below.
        out_shape=jax.ShapeDtypeStruct((B, S * d_head), embeddings.dtype),
        grid_spec=pltpu.PrefetchScalarGridSpec(
            num_scalar_prefetch=0,
            grid=(B // bb,),
            in_specs=[
                pl.BlockSpec((bb, S, d_model), lambda i: (i, 0, 0)),
                # Resident weight/bias tiles (constant index_map).
                pl.BlockSpec((d_model, 3 * d_head), lambda i: (0, 0)),
                pl.BlockSpec((1, 3 * d_head), lambda i: (0, 0)),
            ],
            out_specs=pl.BlockSpec((bb, S * d_head), lambda i: (i, 0)),
        ),
        compiler_params=pltpu.CompilerParams(
            dimension_semantics=("parallel",),
            vmem_limit_bytes=32 * 1024 * 1024),
    )(embeddings, wqkv, bqkv)

    return out_flat.reshape(B, S, d_head)


def _reference(embeddings, wq, bq, wk, bk, wv, bv, *, mask=True):
    """Pure-JAX f32 reference mirroring the PyTorch forward()."""
    x = embeddings.astype(jnp.float32)
    q = x @ wq + bq
    k = x @ wk + bk
    v = x @ wv + bv
    d_head = wq.shape[1]
    scores = q @ jnp.swapaxes(k, -1, -2)
    scaled = scores / (d_head ** 0.5)
    s = scores.shape[-1]
    causal = jnp.triu(jnp.ones((s, s), dtype=bool), k=1)
    masked = jnp.where(causal, -jnp.inf, scaled)
    logits = masked if mask else scores
    pattern = jax.nn.softmax(logits, axis=-1)
    return (pattern @ v).astype(embeddings.dtype)


if __name__ == "__main__":
    # Small config consistent with the module: d_model=32, d_head=16,
    # seq (num patches)=8, batch=2, causal mask enabled.
    B, S, D_MODEL, D_HEAD = 2, 8, 32, 16
    MASK = True

    key = jax.random.PRNGKey(0)
    k_x, k_wq, k_bq, k_wk, k_bk, k_wv, k_bv = jax.random.split(key, 7)

    x = jax.random.normal(k_x, (B, S, D_MODEL), dtype=jnp.float32)

    # Deterministic parameter init (shapes from nn.Linear(d_model, d_head)).
    scale = 1.0 / (D_MODEL ** 0.5)
    wq = jax.random.uniform(k_wq, (D_MODEL, D_HEAD), minval=-scale, maxval=scale)
    bq = jax.random.uniform(k_bq, (D_HEAD,), minval=-scale, maxval=scale)
    wk = jax.random.uniform(k_wk, (D_MODEL, D_HEAD), minval=-scale, maxval=scale)
    bk = jax.random.uniform(k_bk, (D_HEAD,), minval=-scale, maxval=scale)
    wv = jax.random.uniform(k_wv, (D_MODEL, D_HEAD), minval=-scale, maxval=scale)
    bv = jax.random.uniform(k_bv, (D_HEAD,), minval=-scale, maxval=scale)
    # NOTE: self.output (nn.Linear(d_head, d_model)) is unused in the reference
    # forward(), so it is intentionally not applied here.

    out = attention_head(x, wq, bq, wk, bk, wv, bv, mask=MASK)
    out = jax.block_until_ready(out)

    ref = _reference(x, wq, bq, wk, bk, wv, bv, mask=MASK)
    assert out.shape == (B, S, D_HEAD), out.shape
    # Tolerance accounts for bf16 MXU operands (QKV and PV matmuls) and the
    # approximate EUP reciprocal in the softmax denominator, vs. an f32 reference.
    assert jnp.allclose(out, ref, atol=2e-2, rtol=2e-2), \
        float(jnp.max(jnp.abs(out - ref)))

    print("KERNEL_OK")
</pallas_src>

<mosaic_0001>
module attributes {stable_mosaic.version = 11 : i64} {
  func.func @_attention_head_kernel(%arg0: i32, %arg1: memref<2x8x32xf32, #tpu.memory_space<vmem>>, %arg2: memref<32x48xbf16, #tpu.memory_space<vmem>>, %arg3: memref<1x48xf32, #tpu.memory_space<vmem>>, %arg4: memref<2x128xf32, #tpu.memory_space<vmem>>) attributes {dimension_semantics = [#tpu.dimension_semantics<parallel>], iteration_bounds = array<i64: 1>, scalar_prefetch = 0 : i64, scratch_operands = 0 : i64, tpu.core_type = #tpu.core_type<tc>, window_params = [{transform_indices = @transform_0, window_bounds = array<i64: 2, 8, 32>}, {pipeline_mode = #tpu.pipeline_mode<synchronous>, transform_indices = @transform_1, window_bounds = array<i64: 32, 48>}, {pipeline_mode = #tpu.pipeline_mode<synchronous>, transform_indices = @transform_2, window_bounds = array<i64: 1, 48>}, {transform_indices = @transform_3, window_bounds = array<i64: 2, 128>}]} {
    %c0 = arith.constant 0 : index
    %c0_0 = arith.constant 0 : index
    %c0_1 = arith.constant 0 : index
    %0 = vector.load %arg1[%c0, %c0_0, %c0_1] : memref<2x8x32xf32, #tpu.memory_space<vmem>>, vector<2x8x32xf32>
    %1 = vector.shape_cast %0 : vector<2x8x32xf32> to vector<16x32xf32>
    %2 = arith.truncf %1 : vector<16x32xf32> to vector<16x32xbf16>
    %c0_2 = arith.constant 0 : index
    %c0_3 = arith.constant 0 : index
    %3 = vector.load %arg2[%c0_2, %c0_3] : memref<32x48xbf16, #tpu.memory_space<vmem>>, vector<32x48xbf16>
    %cst = arith.constant dense<0.000000e+00> : vector<16x48xf32>
    %4 = tpu.matmul %2, %3, %cst {dimension_numbers = #tpu.dot_dimension_numbers<[1], [0], [0], [1], [0, 0, 1, 1], [], []>} : vector<16x32xbf16>, vector<32x48xbf16>, vector<16x48xf32> -> vector<16x48xf32>
    %c0_4 = arith.constant 0 : index
    %c0_5 = arith.constant 0 : index
    %5 = vector.load %arg3[%c0_4, %c0_5] : memref<1x48xf32, #tpu.memory_space<vmem>>, vector<1x48xf32>
    %6 = vector.broadcast %5 : vector<1x48xf32> to vector<16x48xf32>
    %7 = arith.addf %4, %6 : vector<16x48xf32>
    %8 = vector.shape_cast %7 : vector<16x48xf32> to vector<2x8x48xf32>
    %9 = vector.extract_strided_slice %8 {offsets = [0, 0, 0], sizes = [2, 8, 16], strides = [1, 1, 1]} : vector<2x8x48xf32> to vector<2x8x16xf32>
    %10 = vector.extract_strided_slice %8 {offsets = [0, 0, 16], sizes = [2, 8, 16], strides = [1, 1, 1]} : vector<2x8x48xf32> to vector<2x8x16xf32>
    %11 = vector.extract_strided_slice %8 {offsets = [0, 0, 32], sizes = [2, 8, 16], strides = [1, 1, 1]} : vector<2x8x48xf32> to vector<2x8x16xf32>
    %cst_6 = arith.constant dense<0.000000e+00> : vector<2x8x8xf32>
    %12 = tpu.matmul %9, %10, %cst_6 {dimension_numbers = #tpu.dot_dimension_numbers<[2], [2], [1], [1], [0, 0, 0, 1, 1, 1], [0], [0]>} : vector<2x8x16xf32>, vector<2x8x16xf32>, vector<2x8x8xf32> -> vector<2x8x8xf32>
    %13 = tpu.iota {dimensions = array<i32: 0>} : vector<8x8xi32>
    %14 = tpu.iota {dimensions = array<i32: 1>} : vector<8x8xi32>
    %15 = arith.cmpi sgt, %14, %13 : vector<8x8xi32>
    %16 = vector.shape_cast %15 : vector<8x8xi1> to vector<1x8x8xi1>
    %cst_7 = arith.constant 0xFF800000 : f32
    %17 = vector.shape_cast %16 : vector<1x8x8xi1> to vector<1x8x8xi1>
    %18 = vector.broadcast %17 : vector<1x8x8xi1> to vector<2x8x8xi1>
    %19 = vector.broadcast %cst_7 : f32 to vector<2x8x8xf32>
    %20 = arith.select %18, %19, %12 : vector<2x8x8xi1>, vector<2x8x8xf32>
    %cst_8 = arith.constant dense<0xFF800000> : vector<2x8xf32>
    %21 = vector.multi_reduction <maximumf>, %20, %cst_8 [2] : vector<2x8x8xf32> to vector<2x8xf32>
    %22 = vector.shape_cast %21 : vector<2x8xf32> to vector<2x8x1xf32>
    %23 = vector.broadcast %22 : vector<2x8x1xf32> to vector<2x8x8xf32>
    %24 = arith.subf %20, %23 : vector<2x8x8xf32>
    %25 = math.exp %24 : vector<2x8x8xf32>
    %cst_9 = arith.constant dense<0.000000e+00> : vector<2x8xf32>
    %26 = vector.multi_reduction <add>, %25, %cst_9 [2] : vector<2x8x8xf32> to vector<2x8xf32>
    %27 = vector.shape_cast %26 : vector<2x8xf32> to vector<2x8x1xf32>
    %28 = tpu.reciprocal %27 {approx = true} : vector<2x8x1xf32> -> vector<2x8x1xf32>
    %29 = vector.broadcast %28 : vector<2x8x1xf32> to vector<2x8x8xf32>
    %30 = arith.mulf %25, %29 : vector<2x8x8xf32>
    %31 = arith.truncf %30 : vector<2x8x8xf32> to vector<2x8x8xbf16>
    %32 = arith.truncf %11 : vector<2x8x16xf32> to vector<2x8x16xbf16>
    %cst_10 = arith.constant dense<0.000000e+00> : vector<2x8x16xf32>
    %33 = tpu.matmul %31, %32, %cst_10 {dimension_numbers = #tpu.dot_dimension_numbers<[2], [1], [1], [2], [0, 0, 0, 1, 1, 2], [0], [0]>} : vector<2x8x8xbf16>, vector<2x8x16xbf16>, vector<2x8x16xf32> -> vector<2x8x16xf32>
    %34 = vector.shape_cast %33 : vector<2x8x16xf32> to vector<2x128xf32>
    %c0_11 = arith.constant 0 : index
    %c0_12 = arith.constant 0 : index
    %35 = vector.load %arg4[%c0_11, %c0_12] : memref<2x128xf32, #tpu.memory_space<vmem>>, vector<2x128xf32>
    tpu.vector_store %arg4[%c0_11, %c0_12], %34 {strides = array<i32>} : memref<2x128xf32, #tpu.memory_space<vmem>>, vector<2x128xf32>,
    return
  }
  func.func @transform_0(%arg0: i32) -> (i32, i32, i32) {
    %c0_i32 = arith.constant 0 : i32
    %c0_i32_0 = arith.constant 0 : i32
    %c0_i32_1 = arith.constant 0 : i32
    return %arg0, %c0_i32, %c0_i32_0 : i32, i32, i32
  }
  func.func @transform_1(%arg0: i32) -> (i32, i32) {
    %c0_i32 = arith.constant 0 : i32
    %c0_i32_0 = arith.constant 0 : i32
    %c0_i32_1 = arith.constant 0 : i32
    return %c0_i32, %c0_i32_0 : i32, i32
  }
  func.func @transform_2(%arg0: i32) -> (i32, i32) {
    %c0_i32 = arith.constant 0 : i32
    %c0_i32_0 = arith.constant 0 : i32
    %c0_i32_1 = arith.constant 0 : i32
    return %c0_i32, %c0_i32_0 : i32, i32
  }
  func.func @transform_3(%arg0: i32) -> (i32, i32) {
    %c0_i32 = arith.constant 0 : i32
    %c0_i32_0 = arith.constant 0 : i32
    return %arg0, %c0_i32 : i32, i32
  }
}

</mosaic_0001>

<bundles_post_ra>
// kernel: tpu_custom_call.1
= control target key start
LH: loop header
LB: loop body
LE: loop exit
PB: predicated region body
PF: predicated region fallthrough
CT: control target
= control target key end

     0   :  { %8 = vsyncpa [#allocation3], 0  ;;  %s541_s0 = inlined_call_operand.hbm [shape: f32[2,8,32], index: 0, kind: input, shape index: {}]   ;;  %s542_s1 = inlined_call_operand.hbm [shape: bf16[32,48], index: 1, kind: input, shape index: {}]   ;;  %s543_s2 = inlined_call_operand.vmem [shape: f32[1,48], index: 2, kind: input, shape index: {}]   ;;  %s544_s3 = inlined_call_operand.hbm [shape: f32[2,128], index: 3, kind: output, shape index: {}]  }
   0x1   :  { %9 = vsyncpa [#allocation6], 0 }
   0x2   :  { %10 = vsyncpa [#allocation4], 0  ;;  %s15_s14 = sshll.u32 %s541_s0, 4  ;;  %s460_s15 = smov [#allocation2]   ;;  %s16_s14 = int_to_ptr.hbm [resolvable:$true] %s15_s14 }
   0x3   :  { %s17_s16 = sshll.u32 %s460_s15, 4  ;;  %s28_s19 = sshll.u32 %s542_s1, 4  ;;  %s18_s16 = int_to_ptr.vmem [resolvable:$true] %s17_s16  ;;  %s29_s19 = int_to_ptr.hbm [resolvable:$true] %s28_s19 }
   0x4   :  { %s461_s20 = smov 128   ;;  %s462_s21 = smov 8  }
   0x5   :  { %23 = dma.hbm_to_vmem [thread:$0]  %s16_s14, 256, %s18_s16, [#allocation3], %s461_s20, %s461_s20, %s462_s21  }
   0x6   :  { %s463_s22 = smov [#allocation5]   ;;  %s464_s24 = smov 64  }
   0x7   :  { %s30_s23 = sshll.u32 %s463_s22, 4  ;;  %s465_s25 = smov 4   ;;  %s31_s23 = int_to_ptr.vmem [resolvable:$true] %s30_s23 }
   0x8   :  { %36 = dma.hbm_to_vmem [thread:$0]  %s29_s19, 256, %s31_s23, [#allocation6], %s464_s24, %s464_s24, %s465_s25  }
   0x9   :  { %454 = dma.done.wait [#allocation3], 256  }
   0xa   :  { %455 = vsyncadd [#allocation3], 4294967040 }
   0xb   :  { %456 = dma.done.wait [#allocation6], 256  }
   0xc   :  { %457 = vsyncadd [#allocation6], 4294967040  ;;  %v357_v0 = vld [vmem:[#allocation5 + $0x8] sm:$0xff]  ;;  %v356_v1 = vld [vmem:[#allocation5] sm:$0xff]  ;;  %vm71_vm0 = vcmask 261120   ;;  %s466_s26 = smov 112   ;;  %v144_v17 = vlaneseq }
   0xd   :  { %81 = vmatpush.bf16.msra.mxu0 %v357_v0  ;;  %v48_v2 = vld [vmem:[#allocation2] sm:$0xff]  ;;  %v49_v3 = vld [vmem:[#allocation2 + $0x8] sm:$0xff]  ;;  %s467_s27 = smov 96   ;;  %vm92_vm1 = vcmask 130048   ;;  %vm188_vm2 = vcmask 1043456   ;;  %vm153_vm4 = vcmask 64512  }
   0xe   :  { %v50_v4 = vpack.c.bf16 %v49_v3, %v48_v2  ;;  %v373_v5 = vld [vmem:[%s543_s2] ss:$0 sm:$0xff]  ;;  %v145_v18 = vshrl.u32 %v144_v17, 7  ;;  %v147_v19 = vand.u32 127, %v144_v17  ;;  %v468_v49 = vmov 1983009808  }
   0xf   :  { %v233_v50 = vunpack.c.l.s4 %v468_v49  ;;  %v469_v52 = vmov 1934713408   ;;  %vm230_vm5 = vcmask 1047556   ;;  %s470_s2 = smov 32   ;;  %s471_s28 = smov 16   ;;  %vm312_vm6 = vcmask 392192  }
  0x10   :  { %vm148_vm3 = vcmp.gt.s32.totalorder %v147_v19, %v145_v18  ;;  %v255_v53 = vunpack.c.l.s4 %v469_v52  ;;  %s472_s29 = smov 48   ;;  %s473_s30 = smov 80   ;;  %vm314_vm7 = vcmask 523264   ;;  %vm316_vm8 = vcmask 654336  }
  0x11   :  { %82 = vmatpush.bf16.msra.mxu0 %v356_v1  ;;  %v234_v51 = vunpack.c.0.s8 %v233_v50  ;;  %vm318_vm9 = vcmask 785408   ;;  %s474_s4 = smov [#allocation7]   ;;  %s330_s8 = sshll.u32 %s544_s3, 4  ;;  %vm320_vm10 = vcmask 916480   ;;  %s331_s8 = int_to_ptr.hbm [resolvable:$true] %s330_s8 }
  0x12   :  { %v256_v58 = vunpack.c.0.s8 %v255_v53  ;;  %s328_s5 = sshll.u32 %s474_s4, 4  ;;  %s329_s5 = int_to_ptr.vmem [resolvable:$true] %s328_s5 }
  0x14   :  { %349 = vmatmul.msk.bf16.vlgmr.msra.gmra.mxu0 %vm71_vm0, %v50_v4 }
  0x91   :  { %v84_v6 = vpop.f32.mrf.mxu0 }
  0x92   :  { %v85_v7 = vadd.f32 %v373_v5, %v84_v6 }
  0x94   :  { %90 = vrot.lane.b32.xlu0 %v85_v7, %s466_s26  ;;  %v178_v10 = vpack.c.bf16 %v85_v7, %v85_v7 }
  0x96   :  { %v181_v11 = vunpack.c.l.b16 %v178_v10 }
  0x98   :  { %v182_v12 = vpack.c.b16 %v181_v11, %v181_v11 }
  0x99   :  { %v86_v8 = vpop.f32.mrf.mxu0 }
  0x9a   :  { %v87_v9 = vadd.f32 %v373_v5, %v86_v8 }
  0x9c   :  { %118 = vrot.lane.b32.xlu0 %v87_v9, %s466_s26  ;;  %v179_v26 = vpack.c.bf16 %v87_v9, %v87_v9 }
  0x9e   :  { %v206_v27 = vunpack.c.l.b16 %v179_v26 }
  0xa0   :  { %v207_v28 = vpack.c.b16 %v206_v27, %v206_v27 }
  0xa4   :  { %183 = vrot.lane.b32.xlu0 %v182_v12, %s467_s27 }
 0x106   :  { %v91_v13 = vpop.permute.xlu0 %90 }
 0x107   :  { %350 = vmatpush.xpose.msk.msra.mxu2 %vm92_vm1, %v91_v13 }
 0x10a   :  { %351 = vmatmul.msk.f32.vlgmr.msra.gmra.mxu2 %vm92_vm1, %v85_v7 }
 0x10e   :  { %v119_v14 = vpop.permute.xlu0 %118 }
 0x10f   :  { %352 = vmatpush.xpose.msk.msrb.mxu2 %vm92_vm1, %v119_v14 }
 0x112   :  { %353 = vmatmul.msk.f32.vlgmr.msrb.gmra.mxu2 %vm92_vm1, %v87_v9 }
 0x116   :  { %v184_v15 = vpop.permute.xlu0 %183 }
 0x117   :  { %v190_v16 = vsel %vm188_vm2, %v184_v15, 0 }
 0x118   :  { %199 = vmatpush.bf16.msra.mxu3 %v190_v16 }
 0x18d   :  { %v114_v20 = vpop.f32.mrf.mxu2 }
 0x18e   :  { %v151_v21 = vsel %vm148_vm3, -inf, %v114_v20 }
 0x18f   :  { %v154_v22 = vsel %vm153_vm4, %v151_v21, -inf }
 0x190   :  { %155 = vmax.xlane.f32.xlu1 %v154_v22 }
 0x195   :  { %v141_v23 = vpop.f32.mrf.mxu2 }
 0x196   :  { %v152_v24 = vsel %vm148_vm3, -inf, %v141_v23 }
 0x197   :  { %v157_v25 = vsel %vm153_vm4, %v152_v24, -inf }
 0x198   :  { %158 = vmax.xlane.f32.xlu1 %v157_v25 }
 0x1b1   :  { %208 = vrot.lane.b32.xlu1 %v207_v28, %s467_s27 }
 0x203   :  { %v156_v29 = vpop.xlane.xlu1 %155 }
 0x204   :  { %v160_v30 = vsub.f32 %v151_v21, %v156_v29 }
 0x206   :  { %v162_v31 = vmul.f32 1.442695, %v160_v30 }
 0x208   :  { %374 = vpow2.f32 %v162_v31 }
 0x20b   :  { %v159_v32 = vpop.xlane.xlu1 %158 }
 0x20c   :  { %v161_v33 = vsub.f32 %v152_v24, %v159_v32 }
 0x20e   :  { %v375_v34 = vpop.eup %374  ;;  %v164_v35 = vmul.f32 1.442695, %v161_v33 }
 0x20f   :  { %v166_v36 = vsel %vm153_vm4, %v375_v34, 0.0 }
 0x210   :  { %376 = vpow2.f32 %v164_v35  ;;  %167 = vadd.xlane.f32.xlu2 %v166_v36 }
 0x216   :  { %v377_v37 = vpop.eup %376 }
 0x217   :  { %v169_v38 = vsel %vm153_vm4, %v377_v37, 0.0 }
 0x218   :  { %170 = vadd.xlane.f32.xlu2 %v169_v38 }
 0x223   :  { %v209_v39 = vpop.permute.xlu1 %208 }
 0x224   :  { %v214_v40 = vsel %vm188_vm2, %v209_v39, 0 }
 0x225   :  { %223 = vmatpush.bf16.msra.mxu1 %v214_v40 }
 0x283   :  { %v168_v41 = vpop.xlane.xlu2 %167 }
 0x284   :  { %378 = vrcp.f32 %v168_v41 }
 0x28a   :  { %v379_v42 = vpop.eup %378 }
 0x28b   :  { %v171_v43 = vpop.xlane.xlu2 %170  ;;  %v174_v44 = vmul.f32 %v379_v42, %v375_v34 }
 0x28c   :  { %380 = vrcp.f32 %v171_v43 }
 0x28d   :  { %v176_v45 = vpack.c.bf16 %v174_v44, %v174_v44 }
 0x28f   :  { %354 = vmatmul.msk.bf16.vlgmr.msra.gmra.mxu3 %vm153_vm4, %v176_v45 }
 0x292   :  { %v381_v46 = vpop.eup %380 }
 0x293   :  { %v175_v47 = vmul.f32 %v381_v46, %v377_v37 }
 0x295   :  { %v177_v48 = vpack.c.bf16 %v175_v47, %v175_v47 }
 0x297   :  { %355 = vmatmul.msk.bf16.vlgmr.msra.gmra.mxu1 %vm153_vm4, %v177_v48 }
 0x312   :  { %v201_v54 = vpop.f32.mrf.mxu3 }
 0x313   :  { %v229_v55 = vrot.slane %v201_v54, 4  ;;  %v235_v56 = vperm.slane %v201_v54, %v234_v51 }
 0x314   :  { %v225_v57 = vpop.f32.mrf.mxu1 }
 0x315   :  { %v231_v59 = vsel %vm230_vm5, 0.0, %v229_v55  ;;  %v252_v60 = vrot.slane %v235_v56, 4  ;;  %v240_v61 = vrot.slane %v225_v57, 4  ;;  %v245_v62 = vperm.slane %v225_v57, %v234_v51 }
 0x316   :  { %v239_v63 = vperm.slane %v231_v59, %v234_v51 }
 0x317   :  { %v241_v0 = vsel %vm230_vm5, 0.0, %v240_v61  ;;  %v250_v1 = vrot.slane %v245_v62, 4  ;;  %v253_v2 = vsel %vm230_vm5, %v245_v62, %v252_v60 }
 0x318   :  { %v264_v3 = vrot.slane %v239_v63, 4  ;;  %v249_v4 = vperm.slane %v241_v0, %v234_v51  ;;  %v261_v5 = vperm.slane %v253_v2, %v256_v58 }
 0x319   :  { %v251_v6 = vsel %vm230_vm5, %v250_v1, %v235_v56 }
 0x31a   :  { %v262_v7 = vrot.slane %v249_v4, 4  ;;  %287 = vrot.lane.b32.xlu0 %v261_v5, %s470_s2  ;;  %v203_v8 = vpop.f32.mrf.mxu3  ;;  %v265_v9 = vsel %vm230_vm5, %v249_v4, %v264_v3  ;;  %v257_v10 = vperm.slane %v251_v6, %v256_v58  ;;  %v276_v15 = vrot.slane %v261_v5, 4 }
 0x31b   :  { %v273_v11 = vperm.slane %v265_v9, %v256_v58 }
 0x31c   :  { %v227_v12 = vpop.f32.mrf.mxu1  ;;  %v274_v13 = vrot.slane %v257_v10, 4  ;;  %v263_v14 = vsel %vm230_vm5, %v262_v7, %v239_v63  ;;  %v277_v18 = vsel %vm230_vm5, 0.0, %v276_v15 }
 0x31d   :  { %303 = vrot.lane.b32.xlu1 %v273_v11, %s467_s27  ;;  %v269_v17 = vperm.slane %v263_v14, %v256_v58  ;;  %v280_v21 = vrot.slane %v273_v11, 4 }
 0x31e   :  { %v275_v16 = vsel %vm230_vm5, 0.0, %v274_v13 }
 0x31f   :  { %283 = vrot.lane.b32.xlu2 %v275_v16, %s471_s28  ;;  %v278_v19 = vrot.slane %v269_v17, 4  ;;  %v281_v22 = vsel %vm230_vm5, 0.0, %v280_v21 }
 0x321   :  { %v279_v20 = vsel %vm230_vm5, 0.0, %v278_v19 }
 0x322   :  { %291 = vrot.lane.b32.xlu0 %v277_v18, %s472_s29 }
 0x327   :  { %299 = vrot.lane.b32.xlu2 %v279_v20, %s473_s30 }
 0x32a   :  { %295 = vrot.lane.b32.xlu0 %v269_v17, %s464_s24 }
 0x332   :  { %307 = vrot.lane.b32.xlu0 %v281_v22, %s466_s26 }
 0x379   :  { %v284_v25 = vpop.permute.xlu2 %283 }
 0x37a   :  { %v310_v26 = vsel %vm92_vm1, %v257_v10, %v284_v25 }
 0x381   :  { %v300_v31 = vpop.permute.xlu2 %299 }
 0x38c   :  { %v288_v23 = vpop.permute.xlu0 %287 }
 0x38d   :  { %v311_v27 = vsel %vm71_vm0, %v310_v26, %v288_v23 }
 0x38f   :  { %v304_v33 = vpop.permute.xlu1 %303 }
 0x394   :  { %v292_v24 = vpop.permute.xlu0 %291 }
 0x395   :  { %v313_v29 = vsel %vm312_vm6, %v311_v27, %v292_v24 }
 0x39c   :  { %v296_v28 = vpop.permute.xlu0 %295 }
 0x39d   :  { %v315_v30 = vsel %vm314_vm7, %v313_v29, %v296_v28 }
 0x39e   :  { %v317_v32 = vsel %vm316_vm8, %v315_v30, %v300_v31 }
 0x39f   :  { %v319_v35 = vsel %vm318_vm9, %v317_v32, %v304_v33 }
 0x3a4   :  { %v308_v34 = vpop.permute.xlu0 %307 }
 0x3a5   :  { %v321_v36 = vsel %vm320_vm10, %v319_v35, %v308_v34 }
 0x3a6   :  { %322 = vst [vmem:[#allocation7] sm:$0x3] %v321_v36 }
 0x3a7   :  { %333 = dma.vmem_to_hbm [thread:$0]  %s329_s5, 32, %s331_s8, [#allocation4]  }
 0x3a8   :  { %458 = dma.done.wait [#allocation4], 32  }
 0x3a9   :  { %459 = vsyncadd [#allocation4], 4294967264 }
 0x3aa   :  { %338 = vsyncpa [#allocation3], 1 }
 0x3ab   :  { %339 = vsyncpa [#allocation6], 1 }
 0x3ac   :  { %340 = vsyncpa [#allocation4], 1 }

</bundles_post_ra>
